<compile_context>
chip_gen: v7x
topology: tpu7x:2x2x1
jax: 0.10.0
libtpu: 0.0.40
codegen_flags: <defaults>
</compile_context>

<pallas_src>
import functools

import jax
import jax.numpy as jnp
from jax.experimental import pallas as pl
from jax.experimental.pallas import tpu as pltpu


# ---------------------------------------------------------------------------
# Kernel
# ---------------------------------------------------------------------------
def pinn_forward_kernel(x_ref, w1_ref, b1_ref, w2_ref, b2_ref, w3_ref, b3_ref,
                        o_ref, *, act_dtype):
    """Transposed MLP: columns of x/o are batch samples (lane axis).

    x_ref : (input_d, tile)     -- normalization already folded into w1/b1
    w1_ref: (hidden, input_d)   b1_ref: (hidden, 1)
    w2_ref: (hidden, hidden)    b2_ref: (hidden, 1)
    w3_ref: (output_d, hidden)  b3_ref: (output_d, 1)
    o_ref : (output_d, tile)
    """
    x = x_ref[...]
    z1 = jnp.dot(w1_ref[...], x,
                 preferred_element_type=jnp.float32) + b1_ref[...]
    h1 = jnp.tanh(z1.astype(act_dtype))
    z2 = jnp.dot(w2_ref[...], h1,
                 preferred_element_type=jnp.float32) + b2_ref[...]
    h2 = jnp.tanh(z2.astype(act_dtype))
    out = jnp.dot(w3_ref[...], h2,
                  preferred_element_type=jnp.float32) + b3_ref[...]
    o_ref[...] = out.astype(o_ref.dtype)


# ---------------------------------------------------------------------------
# Host-side helpers (run under jit, fused by XLA)
# ---------------------------------------------------------------------------
def _fold_normalization(lb, ub, w1, b1):
    """Fold x_norm = 2*(x-lb)/(ub-lb) - 1 into the first layer."""
    rng = ub - lb
    # Guard ub == lb: the PyTorch reference would emit inf/nan here; use a
    # unit range for degenerate dims instead of silently producing NaN weights.
    safe = jnp.where(rng == 0.0, 1.0, rng)
    scale = 2.0 / safe                      # (1, input_d)
    shift = -2.0 * lb / safe - 1.0          # (1, input_d)
    w1f = w1 * scale.reshape(-1, 1)         # scale row i of w1 by scale[i]
    b1f = b1 + shift @ w1                   # (1, hidden)
    return w1f, b1f


def _round_up(v, m):
    return ((v + m - 1) // m) * m


def _num_tensorcores():
    """Best-effort TensorCore count of the local device (v7x has 2/chip)."""
    try:
        return max(1, int(getattr(jax.devices()[0], "num_cores", 1)))
    except Exception:
        return 1


# ---------------------------------------------------------------------------
# Wrapper (whole forward is one jitted program)
# ---------------------------------------------------------------------------
@functools.partial(jax.jit, static_argnames=("max_tile_cols", "use_bf16_tanh"))
def interface_forward(x, lb, ub, params, *, max_tile_cols=32768,
                      use_bf16_tanh=False):
    """Interface.forward(x) via a single Pallas kernel.

    x:      (N, input_d) f32
    lb, ub: (1, input_d) f32 domain bounds for input normalization
    params: dict with w1 (in,h), b1 (1,h), w2 (h,h), b2 (1,h), w3 (h,out),
            b3 (1,out)
    """
    N, input_d = x.shape
    hidden = params["w1"].shape[1]
    output_d = params["w3"].shape[1]

    # --- fold normalization into layer 1 (tiny; fused under jit) ------------
    w1f, b1f = _fold_normalization(lb, ub, params["w1"], params["b1"])
    w1t, b1t = w1f.T, b1f.T                  # (hidden, input_d), (hidden, 1)
    w2t, b2t = params["w2"].T, params["b2"].T
    w3t, b3t = params["w3"].T, params["b3"].T

    # --- chip-aware tile selection ------------------------------------------
    n_cores = _num_tensorcores()
    n_aligned = _round_up(max(N, 1), 128)
    if n_cores >= 2 and n_aligned > 128:
        # Multi-TensorCore chip (v7x): >= 2 grid steps so both cores get work.
        tile = min(max_tile_cols, _round_up(pl.cdiv(n_aligned, 2), 128))
    else:
        # Single-TensorCore chip (v5e/v6e): fewest possible grid steps.
        tile = min(max_tile_cols, n_aligned)
    num_tiles = pl.cdiv(N, tile)
    n_pad = num_tiles * tile

    # pad + transpose fuse into one XLA copy under jit; batch -> lanes so the
    # output block (output_d, tile) is lane-dense (unmasked vector stores).
    if n_pad != N:
        x = jnp.pad(x, ((0, n_pad - N), (0, 0)))
    xt = x.T                                  # (input_d, n_pad)

    full = lambda shape: pl.BlockSpec(shape, lambda i: (0, 0))
    grid_spec = pltpu.PrefetchScalarGridSpec(
        num_scalar_prefetch=0,
        grid=(num_tiles,),
        in_specs=[
            pl.BlockSpec((input_d, tile), lambda i: (0, i)),   # x tile
            full((hidden, input_d)),                           # w1^T (folded)
            full((hidden, 1)),                                 # b1^T (folded)
            full((hidden, hidden)),                            # w2^T
            full((hidden, 1)),                                 # b2^T
            full((output_d, hidden)),                          # w3^T
            full((output_d, 1)),                               # b3^T
        ],
        out_specs=pl.BlockSpec((output_d, tile), lambda i: (0, i)),
    )

    # Per-column VMEM ~0.5-0.6 KB (double-buffered x/out blocks + two
    # (hidden, tile) f32 intermediates); cap at 48 MiB to stay inside v7x's
    # 64 MiB physical VMEM while still allowing 32K-column tiles.
    vmem_limit = int(min(48 << 20, max(16 << 20, 640 * tile + (2 << 20))))

    act_dtype = jnp.bfloat16 if use_bf16_tanh else jnp.float32
    kernel = functools.partial(pinn_forward_kernel, act_dtype=act_dtype)

    out_t = pl.pallas_call(
        kernel,
        out_shape=jax.ShapeDtypeStruct((output_d, n_pad), jnp.float32),
        grid_spec=grid_spec,
        compiler_params=pltpu.CompilerParams(
            dimension_semantics=("parallel",),
            vmem_limit_bytes=vmem_limit),
    )(xt, w1t, b1t, w2t, b2t, w3t, b3t)

    return out_t.T[:N]                        # back to (N, output_d)


# ---------------------------------------------------------------------------
# Pure-JAX reference & param init (for validation)
# ---------------------------------------------------------------------------
def reference_forward(x, lb, ub, params):
    """Pure-JAX reference (unfolded normalization) for correctness checking."""
    xn = 2.0 * (x - lb) / (ub - lb) - 1.0
    h = jnp.tanh(xn @ params["w1"] + params["b1"])
    h = jnp.tanh(h @ params["w2"] + params["b2"])
    return h @ params["w3"] + params["b3"]


def init_params(key, input_d, hidden, output_d):
    ks = jax.random.split(key, 3)

    def glorot(k, fan_in, fan_out):
        lim = jnp.sqrt(6.0 / (fan_in + fan_out))
        return jax.random.uniform(k, (fan_in, fan_out), jnp.float32, -lim, lim)

    return {
        "w1": glorot(ks[0], input_d, hidden),
        "b1": jnp.zeros((1, hidden), jnp.float32),
        "w2": glorot(ks[1], hidden, hidden),
        "b2": jnp.zeros((1, hidden), jnp.float32),
        "w3": glorot(ks[2], hidden, output_d),
        "b3": jnp.zeros((1, output_d), jnp.float32),
    }


# TODO(synk): pinn_loss / boundary_loss / interpolation_loss / pde_loss /
# derivatives / pde rely on torch autograd w.r.t. inputs and on abstract
# subclass methods; they are training-time losses, not part of forward(),
# and are not translated here.

if __name__ == "__main__":
    key = jax.random.PRNGKey(0)
    k_x, k_p = jax.random.split(key)

    # Small shapes consistent with a PINN: (x, t) -> u, hidden=32.
    N, input_d, hidden, output_d = 500, 2, 32, 1   # N not a tile multiple on purpose

    # Domain bounds for input normalization (x in [-1, 1], t in [0, 1]).
    lb = jnp.array([[-1.0, 0.0]], dtype=jnp.float32)
    ub = jnp.array([[1.0, 1.0]], dtype=jnp.float32)

    # Sample collocation points uniformly inside the domain.
    x = jax.random.uniform(k_x, (N, input_d), jnp.float32) * (ub - lb) + lb

    params = init_params(k_p, input_d, hidden, output_d)

    out = interface_forward(x, lb, ub, params)
    out = jax.block_until_ready(out)

    ref = reference_forward(x, lb, ub, params)
    assert out.shape == (N, output_d)
    assert jnp.max(jnp.abs(out - ref)) < 5e-5

    print("KERNEL_OK")
</pallas_src>

<mosaic_0001>
module attributes {stable_mosaic.version = 11 : i64} {
  func.func @pinn_forward_kernel(%arg0: i32, %arg1: memref<2x512xf32, #tpu.memory_space<vmem>>, %arg2: memref<32x2xf32, #tpu.memory_space<vmem>>, %arg3: memref<32x1xf32, #tpu.memory_space<vmem>>, %arg4: memref<32x32xf32, #tpu.memory_space<vmem>>, %arg5: memref<32x1xf32, #tpu.memory_space<vmem>>, %arg6: memref<1x32xf32, #tpu.memory_space<vmem>>, %arg7: memref<1x1xf32, #tpu.memory_space<vmem>>, %arg8: memref<1x512xf32, #tpu.memory_space<vmem>>) attributes {dimension_semantics = [#tpu.dimension_semantics<parallel>], iteration_bounds = array<i64: 1>, scalar_prefetch = 0 : i64, scratch_operands = 0 : i64, tpu.core_type = #tpu.core_type<tc>, window_params = [{transform_indices = @transform_0, window_bounds = array<i64: 2, 512>}, {pipeline_mode = #tpu.pipeline_mode<synchronous>, transform_indices = @transform_1, window_bounds = array<i64: 32, 2>}, {pipeline_mode = #tpu.pipeline_mode<synchronous>, transform_indices = @transform_2, window_bounds = array<i64: 32, 1>}, {pipeline_mode = #tpu.pipeline_mode<synchronous>, transform_indices = @transform_3, window_bounds = array<i64: 32, 32>}, {pipeline_mode = #tpu.pipeline_mode<synchronous>, transform_indices = @transform_4, window_bounds = array<i64: 32, 1>}, {pipeline_mode = #tpu.pipeline_mode<synchronous>, transform_indices = @transform_5, window_bounds = array<i64: 1, 32>}, {pipeline_mode = #tpu.pipeline_mode<synchronous>, transform_indices = @transform_6, window_bounds = array<i64: 1, 1>}, {transform_indices = @transform_7, window_bounds = array<i64: 1, 512>}]} {
    %c0 = arith.constant 0 : index
    %c0_0 = arith.constant 0 : index
    %0 = vector.load %arg1[%c0, %c0_0] : memref<2x512xf32, #tpu.memory_space<vmem>>, vector<2x512xf32>
    %c0_1 = arith.constant 0 : index
    %c0_2 = arith.constant 0 : index
    %1 = vector.load %arg2[%c0_1, %c0_2] : memref<32x2xf32, #tpu.memory_space<vmem>>, vector<32x2xf32>
    %cst = arith.constant dense<0.000000e+00> : vector<32x512xf32>
    %2 = tpu.matmul %1, %0, %cst {dimension_numbers = #tpu.dot_dimension_numbers<[1], [0], [0], [1], [0, 0, 1, 1], [], []>} : vector<32x2xf32>, vector<2x512xf32>, vector<32x512xf32> -> vector<32x512xf32>
    %c0_3 = arith.constant 0 : index
    %c0_4 = arith.constant 0 : index
    %3 = vector.load %arg3[%c0_3, %c0_4] : memref<32x1xf32, #tpu.memory_space<vmem>>, vector<32x1xf32>
    %4 = vector.broadcast %3 : vector<32x1xf32> to vector<32x512xf32>
    %5 = arith.addf %2, %4 : vector<32x512xf32>
    %6 = math.tanh %5 : vector<32x512xf32>
    %c0_5 = arith.constant 0 : index
    %c0_6 = arith.constant 0 : index
    %7 = vector.load %arg4[%c0_5, %c0_6] : memref<32x32xf32, #tpu.memory_space<vmem>>, vector<32x32xf32>
    %cst_7 = arith.constant dense<0.000000e+00> : vector<32x512xf32>
    %8 = tpu.matmul %7, %6, %cst_7 {dimension_numbers = #tpu.dot_dimension_numbers<[1], [0], [0], [1], [0, 0, 1, 1], [], []>} : vector<32x32xf32>, vector<32x512xf32>, vector<32x512xf32> -> vector<32x512xf32>
    %c0_8 = arith.constant 0 : index
    %c0_9 = arith.constant 0 : index
    %9 = vector.load %arg5[%c0_8, %c0_9] : memref<32x1xf32, #tpu.memory_space<vmem>>, vector<32x1xf32>
    %10 = vector.broadcast %9 : vector<32x1xf32> to vector<32x512xf32>
    %11 = arith.addf %8, %10 : vector<32x512xf32>
    %12 = math.tanh %11 : vector<32x512xf32>
    %c0_10 = arith.constant 0 : index
    %c0_11 = arith.constant 0 : index
    %13 = vector.load %arg6[%c0_10, %c0_11] : memref<1x32xf32, #tpu.memory_space<vmem>>, vector<1x32xf32>
    %cst_12 = arith.constant dense<0.000000e+00> : vector<1x512xf32>
    %14 = tpu.matmul %13, %12, %cst_12 {dimension_numbers = #tpu.dot_dimension_numbers<[1], [0], [0], [1], [0, 0, 1, 1], [], []>} : vector<1x32xf32>, vector<32x512xf32>, vector<1x512xf32> -> vector<1x512xf32>
    %c0_13 = arith.constant 0 : index
    %c0_14 = arith.constant 0 : index
    %15 = vector.load %arg7[%c0_13, %c0_14] : memref<1x1xf32, #tpu.memory_space<vmem>>, vector<1x1xf32>
    %16 = vector.broadcast %15 : vector<1x1xf32> to vector<1x512xf32>
    %17 = arith.addf %14, %16 : vector<1x512xf32>
    %c0_15 = arith.constant 0 : index
    %c0_16 = arith.constant 0 : index
    %18 = vector.load %arg8[%c0_15, %c0_16] : memref<1x512xf32, #tpu.memory_space<vmem>>, vector<1x512xf32>
    tpu.vector_store %arg8[%c0_15, %c0_16], %17 {strides = array<i32>} : memref<1x512xf32, #tpu.memory_space<vmem>>, vector<1x512xf32>,
    return
  }
  func.func @transform_0(%arg0: i32) -> (i32, i32) {
    %c0_i32 = arith.constant 0 : i32
    %c0_i32_0 = arith.constant 0 : i32
    return %c0_i32, %arg0 : i32, i32
  }
  func.func @transform_1(%arg0: i32) -> (i32, i32) {
    %c0_i32 = arith.constant 0 : i32
    %c0_i32_0 = arith.constant 0 : i32
    %c0_i32_1 = arith.constant 0 : i32
    return %c0_i32, %c0_i32_0 : i32, i32
  }
  func.func @transform_2(%arg0: i32) -> (i32, i32) {
    %c0_i32 = arith.constant 0 : i32
    %c0_i32_0 = arith.constant 0 : i32
    %c0_i32_1 = arith.constant 0 : i32
    return %c0_i32, %c0_i32_0 : i32, i32
  }
  func.func @transform_3(%arg0: i32) -> (i32, i32) {
    %c0_i32 = arith.constant 0 : i32
    %c0_i32_0 = arith.constant 0 : i32
    %c0_i32_1 = arith.constant 0 : i32
    return %c0_i32, %c0_i32_0 : i32, i32
  }
  func.func @transform_4(%arg0: i32) -> (i32, i32) {
    %c0_i32 = arith.constant 0 : i32
    %c0_i32_0 = arith.constant 0 : i32
    %c0_i32_1 = arith.constant 0 : i32
    return %c0_i32, %c0_i32_0 : i32, i32
  }
  func.func @transform_5(%arg0: i32) -> (i32, i32) {
    %c0_i32 = arith.constant 0 : i32
    %c0_i32_0 = arith.constant 0 : i32
    %c0_i32_1 = arith.constant 0 : i32
    return %c0_i32, %c0_i32_0 : i32, i32
  }
  func.func @transform_6(%arg0: i32) -> (i32, i32) {
    %c0_i32 = arith.constant 0 : i32
    %c0_i32_0 = arith.constant 0 : i32
    %c0_i32_1 = arith.constant 0 : i32
    return %c0_i32, %c0_i32_0 : i32, i32
  }
  func.func @transform_7(%arg0: i32) -> (i32, i32) {
    %c0_i32 = arith.constant 0 : i32
    %c0_i32_0 = arith.constant 0 : i32
    return %c0_i32, %arg0 : i32, i32
  }
}

</mosaic_0001>

<bundles_post_ra>
// kernel: interface_forward.1
= control target key start
LH: loop header
LB: loop body
LE: loop exit
PB: predicated region body
PF: predicated region fallthrough
CT: control target
= control target key end

     0   :  { %v62_v0 = vlaneseq  ;;  %v845_v2 = vmov 1983009808   ;;  %v846_v4 = vmov 0.0   ;;  %v847_v7 = vmov 0   ;;  %s992_s0 = inlined_call_operand.vmem [shape: f32[2,512], index: 0, kind: input, shape index: {}]   ;;  %s993_s2 = inlined_call_operand.vmem [shape: f32[32,1], index: 2, kind: input, shape index: {}]   ;;  %s994_s6 = inlined_call_operand.<no memory space> [shape: f32[1,1], index: 6, kind: input, shape index: {}]   ;;  %s995_s1 = inlined_call_operand.vmem [shape: f32[32,2], index: 1, kind: input, shape index: {}]   ;;  %s996_s4 = inlined_call_operand.vmem [shape: f32[32,1], index: 4, kind: input, shape index: {}]   ;;  %s997_s3 = inlined_call_operand.vmem [shape: f32[32,32], index: 3, kind: input, shape index: {}]   ;;  %s998_s5 = inlined_call_operand.vmem [shape: f32[1,32], index: 5, kind: input, shape index: {}]   ;;  %s999_s7 = inlined_call_operand.vmem [shape: f32[1,512], index: 7, kind: output, shape index: {}]  }
   0x1   :  { %v28_v1 = vld [vmem:[%s992_s0] sm:$0xff]  ;;  %v60_v3 = vunpack.c.l.s4 %v845_v2  ;;  %161 = vmatprep.mubr.f32.mxu0 %v846_v4  ;;  %250 = vmatprep.mubr.f32.mxu1 %v846_v4  ;;  %v12_v5 = vstv %s994_s6  ;;  %v35_v11 = vld [vmem:[%s993_s2 + $0x10] sm:$0xff]  ;;  %v34_v12 = vld [vmem:[%s993_s2 + $0x8] sm:$0xff]  ;;  %vm88_vm0 = vcmask 1041408   ;;  %vm75_vm1 = vcmask 15360  }
   0x2   :  { %v898_v6 = vshrl.u32 %v62_v0, 7  ;;  %778 = vset.pattern.permute.xlu0 %v847_v7  ;;  %v33_v8 = vld [vmem:[%s993_s2] sm:$0xff]  ;;  %779 = vset.pattern.permute.xlu1 %v847_v7  ;;  %13 = vst [vmem:[#allocation2] sm:$0x1] %v12_v5  ;;  %v58_v10 = vcombine.high %v28_v1, %v28_v1  ;;  %v36_v14 = vld [vmem:[%s993_s2 + $0x18] sm:$0xff]  ;;  %v296_v21 = vld [vmem:[%s996_s4 + $0x8] sm:$0xff] }
   0x3   :  { %v61_v9 = vunpack.c.0.s8 %v60_v3  ;;  %39 = vperm.xlu0 %778, %v33_v8   ;;  %49 = vperm.xlu1 %779, %v35_v11   ;;  %v29_v19 = vld [vmem:[%s995_s1] sm:$0xff]  ;;  %v30_v22 = vld [vmem:[%s995_s1 + $0x8] sm:$0xff]  ;;  %v297_v23 = vld [vmem:[%s996_s4 + $0x10] sm:$0xff]  ;;  %vm319_vm2 = vcmask 261120   ;;  %vm713_vm3 = vcmp.lt.s32.totalorder %v62_v0, 512 }
   0x4   :  { %v295_v20 = vld [vmem:[%s996_s4] sm:$0xff]  ;;  %v298_v24 = vld [vmem:[%s996_s4 + $0x18] sm:$0xff]  ;;  %v31_v25 = vld [vmem:[%s995_s1 + $0x10] sm:$0xff] }
   0x5   :  { %v64_v13 = vsub.s32 %v61_v9, %v898_v6  ;;  %v32_v27 = vld [vmem:[%s995_s1 + $0x18] sm:$0xff] }
   0x7   :  { %v65_v15 = vrot.slane %v28_v1, %v64_v13  ;;  %v72_v16 = vrot.slane %v58_v10, %v64_v13  ;;  %44 = vperm.xlu0 %778, %v34_v12   ;;  %54 = vperm.xlu1 %779, %v36_v14  }
   0x9   :  { %v73_v17 = vcombine.high %v65_v15, %v65_v15  ;;  %v74_v18 = vcombine.high %v72_v16, %v72_v16  ;;  %v527_v26 = vld [vmem:[#allocation2] sm:$0x1] }
   0xb   :  { %720 = vmatprep.subr.msk.mxu0 %vm88_vm0, %v73_v17  ;;  %726 = vmatprep.subr.msk.mxu1 %vm88_vm0, %v74_v18 }
   0xc   :  { %721 = vmatpush1.msk.msra.mxu0 %vm88_vm0, %v65_v15  ;;  %727 = vmatpush1.msk.msra.mxu1 %vm88_vm0, %v72_v16 }
   0xd   :  { %722 = vmatmul.mubr.msk.f32.vlgmr.msra.gmra.mrb[0].mxu0 %vm75_vm1, %v29_v19  ;;  %728 = vmatmul.mubr.msk.f32.vlgmr.msra.gmra.mrb[0].mxu1 %vm75_vm1, %v29_v19 }
   0xe   :  { %167 = vmatprep.mubr.f32.mxu0 %v846_v4  ;;  %256 = vmatprep.mubr.f32.mxu1 %v846_v4 }
   0xf   :  { %301 = vperm.xlu0 %778, %v295_v20   ;;  %306 = vperm.xlu1 %779, %v296_v21  }
  0x11   :  { %723 = vmatmul.mubr.msk.f32.gmra.mrb[2].mxu0 %vm75_vm1, %v30_v22  ;;  %729 = vmatmul.mubr.msk.f32.gmra.mrb[2].mxu1 %vm75_vm1, %v30_v22 }
  0x12   :  { %173 = vmatprep.mubr.f32.mxu0 %v846_v4  ;;  %262 = vmatprep.mubr.f32.mxu1 %v846_v4 }
  0x13   :  { %311 = vperm.xlu0 %778, %v297_v23   ;;  %316 = vperm.xlu1 %779, %v298_v24  }
  0x15   :  { %724 = vmatmul.mubr.msk.f32.gmra.mrb[4].mxu0 %vm75_vm1, %v31_v25  ;;  %730 = vmatmul.mubr.msk.f32.gmra.mrb[4].mxu1 %vm75_vm1, %v31_v25 }
  0x16   :  { %179 = vmatprep.mubr.f32.mxu0 %v846_v4  ;;  %268 = vmatprep.mubr.f32.mxu1 %v846_v4 }
  0x17   :  { %530 = vperm.xlu0 %778, %v527_v26  }
  0x19   :  { %725 = vmatmul.mubr.msk.f32.gmra.mrb[6].mxu0 %vm75_vm1, %v32_v27  ;;  %731 = vmatmul.mubr.msk.f32.gmra.mrb[6].mxu1 %vm75_vm1, %v32_v27  ;;  %v291_v27 = vld [vmem:[%s997_s3] sm:$0xff] }
  0x1a   :  { %396 = vmatprep.mubr.f32.mxu0 %v846_v4  ;;  %485 = vmatprep.mubr.f32.mxu1 %v846_v4 }
  0x82   :  { %v40_v28 = vpop.permute.xlu0 %39  ;;  %v50_v38 = vpop.permute.xlu1 %49 }
  0x86   :  { %v45_v37 = vpop.permute.xlu0 %44  ;;  %v55_v55 = vpop.permute.xlu1 %54 }
  0xe0   :  { %v163_v29 = vpop.f32.mrb[0].mxu0  ;;  %v252_v30 = vpop.f32.mrb[0].mxu1 }
  0xe1   :  { %v164_v31 = vadd.f32 %v163_v29, %v40_v28  ;;  %v253_v32 = vadd.f32 %v252_v30, %v40_v28  ;;  %v165_v33 = vpop.f32.mrb[1].mxu0  ;;  %v254_v34 = vpop.f32.mrb[1].mxu1  ;;  %v293_v29 = vld [vmem:[%s997_s3 + $0x10] sm:$0xff]  ;;  %v294_v30 = vld [vmem:[%s997_s3 + $0x18] sm:$0xff] }
  0xe2   :  { %v166_v35 = vadd.f32 %v165_v33, %v40_v28  ;;  %v255_v36 = vadd.f32 %v254_v34, %v40_v28  ;;  %v292_v28 = vld [vmem:[%s997_s3 + $0x8] sm:$0xff] }
  0xe3   :  { %781 = vtanh.f32 %v164_v31  ;;  %v302_v31 = vpop.permute.xlu0 %301 }
  0xe4   :  { %783 = vtanh.f32 %v253_v32  ;;  %v169_v39 = vpop.f32.mrb[2].mxu0  ;;  %v258_v40 = vpop.f32.mrb[2].mxu1 }
  0xe5   :  { %785 = vtanh.f32 %v166_v35  ;;  %v170_v41 = vadd.f32 %v169_v39, %v45_v37  ;;  %v259_v42 = vadd.f32 %v258_v40, %v45_v37  ;;  %v171_v43 = vpop.f32.mrb[3].mxu0  ;;  %v260_v44 = vpop.f32.mrb[3].mxu1 }
  0xe6   :  { %787 = vtanh.f32 %v255_v36  ;;  %v172_v45 = vadd.f32 %v171_v43, %v45_v37  ;;  %v261_v46 = vadd.f32 %v260_v44, %v45_v37  ;;  %v307_v40 = vpop.permute.xlu1 %306 }
  0xe7   :  { %789 = vtanh.f32 %v170_v41 }
  0xe8   :  { %791 = vtanh.f32 %v259_v42  ;;  %v175_v47 = vpop.f32.mrb[4].mxu0  ;;  %v264_v48 = vpop.f32.mrb[4].mxu1 }
  0xe9   :  { %793 = vtanh.f32 %v172_v45  ;;  %v176_v49 = vadd.f32 %v175_v47, %v50_v38  ;;  %v265_v50 = vadd.f32 %v264_v48, %v50_v38  ;;  %v177_v51 = vpop.f32.mrb[5].mxu0  ;;  %v266_v52 = vpop.f32.mrb[5].mxu1 }
  0xea   :  { %795 = vtanh.f32 %v261_v46  ;;  %v178_v53 = vadd.f32 %v177_v51, %v50_v38  ;;  %v267_v54 = vadd.f32 %v266_v52, %v50_v38  ;;  %v312_v48 = vpop.permute.xlu0 %311 }
  0xeb   :  { %797 = vtanh.f32 %v176_v49 }
  0xec   :  { %799 = vtanh.f32 %v265_v50  ;;  %v181_v56 = vpop.f32.mrb[6].mxu0  ;;  %v270_v57 = vpop.f32.mrb[6].mxu1 }
  0xed   :  { %v782_v58 = vpop.eup %781  ;;  %801 = vtanh.f32 %v178_v53  ;;  %v182_v59 = vadd.f32 %v181_v56, %v55_v55  ;;  %v271_v60 = vadd.f32 %v270_v57, %v55_v55  ;;  %v183_v61 = vpop.f32.mrb[7].mxu0 }
  0xee   :  { %v272_v62 = vpop.f32.mrb[7].mxu1  ;;  %v784_v63 = vpop.eup %783  ;;  %803 = vtanh.f32 %v267_v54  ;;  %v184_v1 = vadd.f32 %v183_v61, %v55_v55 }
  0xef   :  { %v273_v2 = vadd.f32 %v272_v62, %v55_v55  ;;  %v786_v3 = vpop.eup %785  ;;  %805 = vtanh.f32 %v182_v59  ;;  %v317_v57 = vpop.permute.xlu1 %316 }
  0xf0   :  { %v788_v5 = vpop.eup %787  ;;  %807 = vtanh.f32 %v271_v60 }
  0xf1   :  { %v790_v7 = vpop.eup %789  ;;  %809 = vtanh.f32 %v184_v1 }
  0xf2   :  { %v792_v8 = vpop.eup %791  ;;  %811 = vtanh.f32 %v273_v2  ;;  %v744_v9 = vpack.c.bf16 %v790_v7, %v782_v58 }
  0xf3   :  { %v794_v10 = vpop.eup %793  ;;  %v752_v11 = vpack.c.bf16 %v792_v8, %v784_v63 }
  0xf4   :  { %v796_v12 = vpop.eup %795  ;;  %v742_v13 = vpack.c.bf16 %v794_v10, %v786_v3 }
  0xf5   :  { %v798_v14 = vpop.eup %797  ;;  %v750_v15 = vpack.c.bf16 %v796_v12, %v788_v5 }
  0xf6   :  { %v800_v16 = vpop.eup %799  ;;  %743 = vmatprep.subr.bf16.mxu0 %v742_v13 }
  0xf7   :  { %v802_v17 = vpop.eup %801  ;;  %751 = vmatprep.subr.bf16.mxu1 %v750_v15  ;;  %745 = vmatpush1.bf16.msra.mxu0 %v744_v9 }
  0xf8   :  { %v804_v18 = vpop.eup %803  ;;  %753 = vmatpush1.bf16.msra.mxu1 %v752_v11 }
  0xf9   :  { %v806_v19 = vpop.eup %805 }
  0xfa   :  { %v808_v20 = vpop.eup %807  ;;  %v748_v21 = vpack.c.bf16 %v806_v19, %v798_v14 }
  0xfb   :  { %v810_v22 = vpop.eup %809  ;;  %v756_v23 = vpack.c.bf16 %v808_v20, %v800_v16 }
  0xfc   :  { %v812_v24 = vpop.eup %811  ;;  %v746_v25 = vpack.c.bf16 %v810_v22, %v802_v17 }
  0xfd   :  { %v754_v26 = vpack.c.bf16 %v812_v24, %v804_v18 }
  0xfe   :  { %747 = vmatprep.subr.bf16.mxu0 %v746_v25 }
  0xff   :  { %755 = vmatprep.subr.bf16.mxu1 %v754_v26  ;;  %749 = vmatpush1.bf16.msra.mxu0 %v748_v21 }
 0x100   :  { %757 = vmatpush1.bf16.msra.mxu1 %v756_v23 }
 0x102   :  { %732 = vmatmul.mubr.msk.f32.vlgmr.msra.gmra.mrb[8].mxu0 %vm319_vm2, %v291_v27 }
 0x103   :  { %736 = vmatmul.mubr.msk.f32.vlgmr.msra.gmra.mrb[8].mxu1 %vm319_vm2, %v291_v27  ;;  %402 = vmatprep.mubr.f32.mxu0 %v846_v4 }
 0x104   :  { %491 = vmatprep.mubr.f32.mxu1 %v846_v4 }
 0x106   :  { %733 = vmatmul.mubr.msk.f32.gmra.mrb[10].mxu0 %vm319_vm2, %v292_v28 }
 0x107   :  { %737 = vmatmul.mubr.msk.f32.gmra.mrb[10].mxu1 %vm319_vm2, %v292_v28  ;;  %408 = vmatprep.mubr.f32.mxu0 %v846_v4 }
 0x108   :  { %497 = vmatprep.mubr.f32.mxu1 %v846_v4 }
 0x10a   :  { %734 = vmatmul.mubr.msk.f32.gmra.mrb[12].mxu0 %vm319_vm2, %v293_v29 }
 0x10b   :  { %738 = vmatmul.mubr.msk.f32.gmra.mrb[12].mxu1 %vm319_vm2, %v293_v29  ;;  %414 = vmatprep.mubr.f32.mxu0 %v846_v4  ;;  %v526_v29 = vld [vmem:[%s998_s5] sm:$0x1] }
 0x10c   :  { %503 = vmatprep.mubr.f32.mxu1 %v846_v4 }
 0x10e   :  { %735 = vmatmul.mubr.msk.f32.gmra.mrb[14].mxu0 %vm319_vm2, %v294_v30 }
 0x10f   :  { %739 = vmatmul.mubr.msk.f32.gmra.mrb[14].mxu1 %vm319_vm2, %v294_v30  ;;  %604 = vmatprep.mubr.f32.mxu0 %v846_v4  ;;  %v848_v30 = vmov 1966171168  }
 0x110   :  { %675 = vmatprep.mubr.f32.mxu1 %v846_v4 }
 0x1d5   :  { %v398_v32 = vpop.f32.mrb[8].mxu0 }
 0x1d6   :  { %v399_v33 = vadd.f32 %v398_v32, %v302_v31  ;;  %v487_v34 = vpop.f32.mrb[8].mxu1  ;;  %v400_v35 = vpop.f32.mrb[9].mxu0  ;;  %v535_v32 = vsub.s32 0, %v898_v6 }
 0x1d7   :  { %v488_v36 = vadd.f32 %v487_v34, %v302_v31  ;;  %v401_v37 = vadd.f32 %v400_v35, %v302_v31  ;;  %v489_v38 = vpop.f32.mrb[9].mxu1 }
 0x1d8   :  { %813 = vtanh.f32 %v399_v33  ;;  %v490_v39 = vadd.f32 %v489_v38, %v302_v31  ;;  %v689_v31 = vunpack.c.l.s4 %v848_v30  ;;  %v531_v33 = vpop.permute.xlu0 %530 }
 0x1d9   :  { %815 = vtanh.f32 %v488_v36  ;;  %v404_v41 = vpop.f32.mrb[10].mxu0  ;;  %v536_v35 = vrot.slane %v531_v33, %v535_v32 }
 0x1da   :  { %817 = vtanh.f32 %v401_v37  ;;  %v405_v42 = vadd.f32 %v404_v41, %v307_v40  ;;  %v493_v43 = vpop.f32.mrb[10].mxu1  ;;  %v406_v44 = vpop.f32.mrb[11].mxu0  ;;  %v690_v34 = vunpack.c.0.s8 %v689_v31 }
 0x1db   :  { %819 = vtanh.f32 %v490_v39  ;;  %v494_v45 = vadd.f32 %v493_v43, %v307_v40  ;;  %v407_v4 = vadd.f32 %v406_v44, %v307_v40  ;;  %v495_v46 = vpop.f32.mrb[11].mxu1 }
 0x1dc   :  { %821 = vtanh.f32 %v405_v42  ;;  %v496_v47 = vadd.f32 %v495_v46, %v307_v40  ;;  %v693_v42 = vsub.s32 %v690_v34, %v898_v6 }
 0x1dd   :  { %823 = vtanh.f32 %v494_v45  ;;  %v410_v49 = vpop.f32.mrb[12].mxu0 }
 0x1de   :  { %825 = vtanh.f32 %v407_v4  ;;  %v411_v50 = vadd.f32 %v410_v49, %v312_v48  ;;  %v499_v51 = vpop.f32.mrb[12].mxu1  ;;  %v412_v52 = vpop.f32.mrb[13].mxu0 }
 0x1df   :  { %827 = vtanh.f32 %v496_v47  ;;  %v500_v53 = vadd.f32 %v499_v51, %v312_v48  ;;  %v413_v54 = vadd.f32 %v412_v52, %v312_v48  ;;  %v501_v55 = vpop.f32.mrb[13].mxu1 }
 0x1e0   :  { %829 = vtanh.f32 %v411_v50  ;;  %v502_v56 = vadd.f32 %v501_v55, %v312_v48 }
 0x1e1   :  { %831 = vtanh.f32 %v500_v53  ;;  %v416_v58 = vpop.f32.mrb[14].mxu0 }
 0x1e2   :  { %v814_v59 = vpop.eup %813  ;;  %833 = vtanh.f32 %v413_v54  ;;  %v417_v60 = vadd.f32 %v416_v58, %v317_v57  ;;  %v505_v61 = vpop.f32.mrb[14].mxu1 }
 0x1e3   :  { %v418_v62 = vpop.f32.mrb[15].mxu0  ;;  %v816_v63 = vpop.eup %815  ;;  %835 = vtanh.f32 %v502_v56  ;;  %v506_v1 = vadd.f32 %v505_v61, %v317_v57 }
 0x1e4   :  { %v419_v2 = vadd.f32 %v418_v62, %v317_v57  ;;  %v507_v3 = vpop.f32.mrb[15].mxu1  ;;  %v818_v5 = vpop.eup %817  ;;  %837 = vtanh.f32 %v417_v60 }
 0x1e5   :  { %v508_v7 = vadd.f32 %v507_v3, %v317_v57  ;;  %v820_v8 = vpop.eup %819  ;;  %839 = vtanh.f32 %v506_v1 }
 0x1e6   :  { %v822_v9 = vpop.eup %821  ;;  %841 = vtanh.f32 %v419_v2 }
 0x1e7   :  { %v824_v10 = vpop.eup %823  ;;  %843 = vtanh.f32 %v508_v7  ;;  %v760_v11 = vpack.c.bf16 %v822_v9, %v814_v59 }
 0x1e8   :  { %v826_v12 = vpop.eup %825  ;;  %v768_v13 = vpack.c.bf16 %v824_v10, %v816_v63 }
 0x1e9   :  { %v828_v14 = vpop.eup %827  ;;  %v758_v15 = vpack.c.bf16 %v826_v12, %v818_v5 }
 0x1ea   :  { %v830_v16 = vpop.eup %829  ;;  %v766_v17 = vpack.c.bf16 %v828_v14, %v820_v8 }
 0x1eb   :  { %v832_v18 = vpop.eup %831  ;;  %759 = vmatprep.subr.bf16.mxu0 %v758_v15 }
 0x1ec   :  { %v834_v19 = vpop.eup %833  ;;  %767 = vmatprep.subr.bf16.mxu1 %v766_v17  ;;  %761 = vmatpush1.bf16.msra.mxu0 %v760_v11 }
 0x1ed   :  { %v836_v20 = vpop.eup %835  ;;  %769 = vmatpush1.bf16.msra.mxu1 %v768_v13 }
 0x1ee   :  { %v838_v21 = vpop.eup %837 }
 0x1ef   :  { %v840_v22 = vpop.eup %839  ;;  %v764_v23 = vpack.c.bf16 %v838_v21, %v830_v16 }
 0x1f0   :  { %v842_v24 = vpop.eup %841  ;;  %v772_v25 = vpack.c.bf16 %v840_v22, %v832_v18 }
 0x1f1   :  { %v844_v26 = vpop.eup %843  ;;  %v762_v27 = vpack.c.bf16 %v842_v24, %v834_v19 }
 0x1f2   :  { %v770_v28 = vpack.c.bf16 %v844_v26, %v836_v20 }
 0x1f3   :  { %763 = vmatprep.subr.bf16.mxu0 %v762_v27 }
 0x1f4   :  { %771 = vmatprep.subr.bf16.mxu1 %v770_v28  ;;  %765 = vmatpush1.bf16.msra.mxu0 %v764_v23 }
 0x1f5   :  { %773 = vmatpush1.bf16.msra.mxu1 %v772_v25 }
 0x1f7   :  { %740 = vmatmul.mubr.msk.f32.vlgmr.msra.gmra.mrb[16].mxu0 %vm319_vm2, %v526_v29 }
 0x1f8   :  { %741 = vmatmul.mubr.msk.f32.vlgmr.msra.gmra.mrb[16].mxu1 %vm319_vm2, %v526_v29 }
 0x2ca   :  { %v606_v36 = vpop.f32.mrb[16].mxu0 }
 0x2cb   :  { %v607_v37 = vadd.f32 %v606_v36, %v536_v35  ;;  %v677_v38 = vpop.f32.mrb[16].mxu1  ;;  %v608_v39 = vpop.f32.mrb[17].mxu0 }
 0x2cc   :  { %v678_v40 = vadd.f32 %v677_v38, %v536_v35  ;;  %v609_v41 = vadd.f32 %v608_v39, %v536_v35  ;;  %v679_v43 = vpop.f32.mrb[17].mxu1 }
 0x2cd   :  { %v680_v44 = vadd.f32 %v679_v43, %v536_v35 }
 0x2ce   :  { %v686_v45 = vcombine.low %v607_v37, %v609_v41 }
 0x2cf   :  { %v687_v4 = vcombine.low %v678_v40, %v680_v44 }
 0x2d0   :  { %v694_v46 = vrot.slane %v686_v45, %v693_v42 }
 0x2d1   :  { %v701_v47 = vrot.slane %v687_v4, %v693_v42 }
 0x2d3   :  { %v702_v48 = vcombine.low %v694_v46, %v701_v47 }
 0x2d5   :  { %v709_v49 = vrot.slane %v702_v48, %v693_v42 }
 0x2d7   :  { %715 = vst.msk [vmem:[%s999_s7] sm:$0xf] %vm713_vm3, %v709_v49 }

</bundles_post_ra>
